<compile_context>
chip_gen: v6e
topology: v6e:2x2x1
jax: 0.10.0
libtpu: 0.0.40
codegen_flags: <defaults>
</compile_context>

<pallas_src>
import jax
import jax.numpy as jnp
from jax.experimental import pallas as pl
from jax.experimental.pallas import tpu as pltpu


def _round_up(x, m):
    return ((x + m - 1) // m) * m


def _vmem_capacity_bytes():
    """Physical VMEM per core (generation-aware), conservative fallback if unavailable."""
    try:
        info = pltpu.get_tpu_info()
        for attr in ("vmem_capacity_bytes", "vmem_size_bytes", "vmem_bytes"):
            v = getattr(info, attr, None)
            if v:
                return int(v)
    except Exception:
        pass
    return 64 * 1024 * 1024  # conservative: v7x physical VMEM


def _working_set_bytes(TN, TK, TO, in_it, out_it, needs_acc):
    # Double-buffered x / w / out tiles (+ f32 accumulator only when output is not f32).
    ws = 2 * TN * TK * in_it + 2 * TK * TO * in_it + 2 * TN * TO * out_it + 2 * TO * 4
    if needs_acc:
        ws += TN * TO * 4
    return ws


# ----------------------------------------------------------------------------- kernels
def _kernel_f32_out(x_ref, w_ref, b_ref, o_ref):
    """f32 output: accumulate directly into the resident output block (no acc scratch)."""
    # x_ref: (TN, TK), w_ref: (1, TK, TO), b_ref: (1, 1, TO), o_ref: (TN, TO) f32
    k = pl.program_id(3)
    partial = jnp.dot(x_ref[...], w_ref[0], preferred_element_type=jnp.float32)

    @pl.when(k == 0)
    def _init():
        o_ref[...] = partial + b_ref[0].astype(jnp.float32)   # bias folded into init

    @pl.when(k > 0)
    def _accum():
        o_ref[...] += partial


def _kernel_acc_scratch(x_ref, w_ref, b_ref, o_ref, acc_ref):
    """Non-f32 output: f32 VMEM accumulator; bias add + downcast once in the epilogue."""
    k = pl.program_id(3)
    partial = jnp.dot(x_ref[...], w_ref[0], preferred_element_type=jnp.float32)

    @pl.when(k == 0)
    def _init():
        acc_ref[...] = partial            # init folded into first dot (no zero-fill pass)

    @pl.when(k > 0)
    def _accum():
        acc_ref[...] += partial

    @pl.when(k == pl.num_programs(3) - 1)
    def _finalize():
        o_ref[...] = (acc_ref[...] + b_ref[0].astype(jnp.float32)).astype(o_ref.dtype)


# ----------------------------------------------------------------------------- wrapper
def linear_parallel(x, weight, bias, *, tn=None, to=None, tk=None,
                    mxu_dtype=jnp.bfloat16):
    """
    Args:
        x:      (batch, parallel_dim, in_dim)
        weight: (parallel_dim, in_dim, out_dim)
        bias:   (parallel_dim, out_dim)
        mxu_dtype: dtype fed to the MXU when x is f32 (None -> keep f32 operands).
    Returns:
        (batch, parallel_dim, out_dim) == einsum('npi,pio->npo', x, weight) + bias,
        in x's original dtype (f32 accumulation + f32 bias add in all cases).
    """
    N, P, I = x.shape
    Pw, Iw, O = weight.shape
    assert (Pw, Iw) == (P, I) and bias.shape == (P, O)
    out_dtype = x.dtype
    needs_acc = jnp.dtype(out_dtype) != jnp.dtype(jnp.float32)

    # ---- feed the MXU bf16 operands (accumulation stays f32, bias add stays f32).
    if mxu_dtype is not None and jnp.dtype(x.dtype) == jnp.dtype(jnp.float32):
        x = x.astype(mxu_dtype)
        weight = weight.astype(mxu_dtype)
    in_it = jnp.dtype(x.dtype).itemsize
    out_it = jnp.dtype(out_dtype).itemsize
    b_it = jnp.dtype(bias.dtype).itemsize

    # ---- generation-aware VMEM budget
    phys = _vmem_capacity_bytes()
    vmem_cap = max(int(phys * 0.8), 32 * 1024 * 1024)   # ~102 MiB v5e/v6e, ~51 MiB v7x
    tile_budget = int(vmem_cap * 0.85)
    big_vmem = phys >= 96 * 1024 * 1024

    # ---- tile selection (lane/sublane aligned; larger tiles on big-VMEM chips)
    tk_t = tk if tk is not None else 1024
    to_t = to if to is not None else (1536 if big_vmem else 1024)
    tn_t = tn if tn is not None else (1536 if big_vmem else 1024)

    TK = _round_up(I, 128) if I <= tk_t else _round_up(tk_t, 128)
    TO = _round_up(O, 128) if O <= to_t else _round_up(to_t, 128)
    if tn is not None:
        TN = tn if N > tn else N
    elif _working_set_bytes(N, TK, TO, in_it, out_it, needs_acc) <= tile_budget:
        TN = N          # full-N block: weights streamed from HBM exactly once per (o,k)
    elif N <= tn_t:
        TN = N
    else:
        TN = _round_up(tn_t, 8)

    # shrink-to-fit while keeping 8/128 alignment (only triggers for oversized requests)
    while (_working_set_bytes(TN, TK, TO, in_it, out_it, needs_acc) > tile_budget
           and max(TO, TK, 0 if TN == N else TN) > 128):
        if TN != N and TN >= max(TO, TK) and TN > 128:
            TN = max(128, (TN // 2) // 8 * 8)
        elif TO >= TK and TO > 128:
            TO = max(128, (TO // 2) // 128 * 128)
        elif TK > 128:
            TK = max(128, (TK // 2) // 128 * 128)
        else:
            break

    Np = _round_up(N, TN)
    Ip = _round_up(I, TK)
    Op = _round_up(O, TO)

    # ---- zero-pad only when needed (no-op for 128-aligned production shapes)
    if (Np, Ip) != (N, I):
        x = jnp.pad(x, ((0, Np - N), (0, 0), (0, Ip - I)))
    if (Ip, Op) != (I, O):
        weight = jnp.pad(weight, ((0, 0), (0, Ip - I), (0, Op - O)))
    if Op != O:
        bias = jnp.pad(bias, ((0, 0), (0, Op - O)))

    # Free (metadata-only) reshapes: no HBM transpose of activations or output.
    x2d = x.reshape(Np, P * Ip)
    b3d = bias.reshape(P, 1, Op)

    NB, OB, KB = Np // TN, Op // TO, Ip // TK

    # ---- grid: K innermost ("arbitrary"); the largest independent axis leads so both
    #      v7x TensorCores get balanced work (no-op on single-TC v5e/v6e).
    extents = {"p": P, "n": NB, "o": OB}
    order = sorted(extents, key=lambda a: -extents[a]) + ["k"]
    pos = {a: i for i, a in enumerate(order)}
    grid = (extents[order[0]], extents[order[1]], extents[order[2]], KB)

    def remap(fn):
        def index_map(a, b, c, d):
            idx = (a, b, c, d)
            return fn(idx[pos["p"]], idx[pos["n"]], idx[pos["o"]], idx[pos["k"]])
        return index_map

    x_spec = pl.BlockSpec((TN, TK), remap(lambda p, n, o, k: (n, p * KB + k)))
    w_spec = pl.BlockSpec((1, TK, TO), remap(lambda p, n, o, k: (p, k, o)))
    b_spec = pl.BlockSpec((1, 1, TO), remap(lambda p, n, o, k: (p, 0, o)))
    o_spec = pl.BlockSpec((TN, TO), remap(lambda p, n, o, k: (n, p * OB + o)))

    cost = pl.CostEstimate(
        flops=2 * P * N * I * O,
        transcendentals=0,
        bytes_accessed=(N * P * I * in_it + P * I * O * in_it
                        + P * O * b_it + N * P * O * out_it),
    )

    ws = _working_set_bytes(TN, TK, TO, in_it, out_it, needs_acc)
    vmem_limit = int(min(max(vmem_cap, int(ws * 1.25)), int(phys * 0.9)))

    kernel = _kernel_acc_scratch if needs_acc else _kernel_f32_out
    scratch = [pltpu.VMEM((TN, TO), jnp.float32)] if needs_acc else []

    out2d = pl.pallas_call(
        kernel,
        out_shape=jax.ShapeDtypeStruct((Np, P * Op), out_dtype),
        grid_spec=pltpu.PrefetchScalarGridSpec(
            num_scalar_prefetch=0,
            grid=grid,
            in_specs=[x_spec, w_spec, b_spec],
            out_specs=o_spec,
            scratch_shapes=scratch,
        ),
        compiler_params=pltpu.CompilerParams(
            dimension_semantics=("parallel", "parallel", "parallel", "arbitrary"),
            vmem_limit_bytes=vmem_limit,
        ),
        cost_estimate=cost,
    )(x2d, weight, b3d)

    out = out2d.reshape(Np, P, Op)          # free reshape back to (N, P, O) layout
    if (Np, Op) != (N, O):
        out = out[:N, :, :O]
    return out


def init_params(key, in_dim, out_dim, parallel_dim, dtype=jnp.float32):
    """Matches LinearParallel.reset_parameters: U(-1/sqrt(in_dim), 1/sqrt(in_dim))."""
    bound = 1.0 / (in_dim ** 0.5)
    kw, kb = jax.random.split(key)
    weight = jax.random.uniform(
        kw, (parallel_dim, in_dim, out_dim), dtype=dtype, minval=-bound, maxval=bound
    )
    bias = jax.random.uniform(
        kb, (parallel_dim, out_dim), dtype=dtype, minval=-bound, maxval=bound
    )
    return weight, bias


if __name__ == "__main__":
    # Small shapes consistent with the module's forward: x = (batch, parallel_dim, in_dim)
    batch_size, parallel_dim, in_dim, out_dim = 2, 4, 32, 16

    key = jax.random.PRNGKey(0)
    kx, kp = jax.random.split(key)
    x = jax.random.normal(kx, (batch_size, parallel_dim, in_dim), dtype=jnp.float32)
    weight, bias = init_params(kp, in_dim, out_dim, parallel_dim)

    ref = jnp.einsum("npi,pio->npo", x, weight) + bias[None, :, :]

    # Default bf16-MXU path (f32 accumulation, f32 bias add, f32 output).
    out = jax.block_until_ready(linear_parallel(x, weight, bias))
    assert out.shape == (batch_size, parallel_dim, out_dim)
    assert out.dtype == x.dtype
    assert jnp.allclose(out, ref, atol=5e-2, rtol=5e-2)

    # Full-precision path (f32 operands on the MXU) for tight-tolerance verification.
    out_f32 = jax.block_until_ready(linear_parallel(x, weight, bias, mxu_dtype=None))
    assert jnp.allclose(out_f32, ref, atol=1e-5, rtol=1e-5)

    # bf16-in / bf16-out path exercises the f32-accumulator-scratch kernel.
    out_bf16 = jax.block_until_ready(
        linear_parallel(x.astype(jnp.bfloat16), weight.astype(jnp.bfloat16),
                        bias.astype(jnp.bfloat16))
    )
    assert out_bf16.dtype == jnp.bfloat16
    assert jnp.allclose(out_bf16.astype(jnp.float32), ref, atol=5e-2, rtol=5e-2)

    print("KERNEL_OK")
</pallas_src>

<mosaic_0001>
module attributes {stable_mosaic.version = 11 : i64} {
  func.func @_kernel_f32_out(%arg0: i32, %arg1: i32, %arg2: i32, %arg3: i32, %arg4: memref<2x128xbf16, #tpu.memory_space<vmem>>, %arg5: memref<1x128x128xbf16, #tpu.memory_space<vmem>>, %arg6: memref<1x1x128xf32, #tpu.memory_space<vmem>>, %arg7: memref<2x128xf32, #tpu.memory_space<vmem>>) attributes {dimension_semantics = [#tpu.dimension_semantics<parallel>, #tpu.dimension_semantics<parallel>, #tpu.dimension_semantics<parallel>, #tpu.dimension_semantics<arbitrary>], iteration_bounds = array<i64: 4, 1, 1, 1>, scalar_prefetch = 0 : i64, scratch_operands = 0 : i64, tpu.core_type = #tpu.core_type<tc>, window_params = [{transform_indices = @transform_0, window_bounds = array<i64: 2, 128>}, {transform_indices = @transform_1, window_bounds = array<i64: 1, 128, 128>}, {transform_indices = @transform_2, window_bounds = array<i64: 1, 1, 128>}, {transform_indices = @transform_3, window_bounds = array<i64: 2, 128>}]} {
    %c0 = arith.constant 0 : index
    %c0_0 = arith.constant 0 : index
    %0 = vector.load %arg4[%c0, %c0_0] : memref<2x128xbf16, #tpu.memory_space<vmem>>, vector<2x128xbf16>
    %c0_1 = arith.constant 0 : index
    %c0_2 = arith.constant 0 : index
    %c0_3 = arith.constant 0 : index
    %1 = vector.load %arg5[%c0_1, %c0_2, %c0_3] : memref<1x128x128xbf16, #tpu.memory_space<vmem>>, vector<1x128x128xbf16>
    %2 = vector.shape_cast %1 : vector<1x128x128xbf16> to vector<128x128xbf16>
    %cst = arith.constant dense<0.000000e+00> : vector<2x128xf32>
    %3 = tpu.matmul %0, %2, %cst {dimension_numbers = #tpu.dot_dimension_numbers<[1], [0], [0], [1], [0, 0, 1, 1], [], []>} : vector<2x128xbf16>, vector<128x128xbf16>, vector<2x128xf32> -> vector<2x128xf32>
    %c0_i32 = arith.constant 0 : i32
    %4 = arith.cmpi eq, %arg3, %c0_i32 : i32
    %5 = arith.extui %4 : i1 to i32
    %c0_i32_4 = arith.constant 0 : i32
    %6 = arith.cmpi ne, %5, %c0_i32_4 : i32
    scf.if %6 {
      %c0_7 = arith.constant 0 : index
      %c0_8 = arith.constant 0 : index
      %c0_9 = arith.constant 0 : index
      %10 = vector.load %arg6[%c0_7, %c0_8, %c0_9] : memref<1x1x128xf32, #tpu.memory_space<vmem>>, vector<1x1x128xf32>
      %11 = vector.shape_cast %10 : vector<1x1x128xf32> to vector<1x128xf32>
      %12 = vector.broadcast %11 : vector<1x128xf32> to vector<2x128xf32>
      %13 = arith.addf %3, %12 : vector<2x128xf32>
      %c0_10 = arith.constant 0 : index
      %c0_11 = arith.constant 0 : index
      %14 = vector.load %arg7[%c0_10, %c0_11] : memref<2x128xf32, #tpu.memory_space<vmem>>, vector<2x128xf32>
      tpu.vector_store %arg7[%c0_10, %c0_11], %13 {strides = array<i32>} : memref<2x128xf32, #tpu.memory_space<vmem>>, vector<2x128xf32>,
    } else {
    }
    %c0_i32_5 = arith.constant 0 : i32
    %7 = arith.cmpi sgt, %arg3, %c0_i32_5 : i32
    %8 = arith.extui %7 : i1 to i32
    %c0_i32_6 = arith.constant 0 : i32
    %9 = arith.cmpi ne, %8, %c0_i32_6 : i32
    scf.if %9 {
      %c0_7 = arith.constant 0 : index
      %c0_8 = arith.constant 0 : index
      %10 = vector.load %arg7[%c0_7, %c0_8] : memref<2x128xf32, #tpu.memory_space<vmem>>, vector<2x128xf32>
      %11 = arith.addf %10, %3 : vector<2x128xf32>
      %c0_9 = arith.constant 0 : index
      %c0_10 = arith.constant 0 : index
      %12 = vector.load %arg7[%c0_9, %c0_10] : memref<2x128xf32, #tpu.memory_space<vmem>>, vector<2x128xf32>
      tpu.vector_store %arg7[%c0_9, %c0_10], %11 {strides = array<i32>} : memref<2x128xf32, #tpu.memory_space<vmem>>, vector<2x128xf32>,
    } else {
    }
    return
  }
  func.func @transform_0(%arg0: i32, %arg1: i32, %arg2: i32, %arg3: i32) -> (i32, i32) {
    %c1_i32 = arith.constant 1 : i32
    %0 = arith.muli %arg0, %c1_i32 : i32
    %1 = arith.addi %0, %arg3 : i32
    %c0_i32 = arith.constant 0 : i32
    return %arg1, %1 : i32, i32
  }
  func.func @transform_1(%arg0: i32, %arg1: i32, %arg2: i32, %arg3: i32) -> (i32, i32, i32) {
    %c0_i32 = arith.constant 0 : i32
    return %arg0, %arg3, %arg2 : i32, i32, i32
  }
  func.func @transform_2(%arg0: i32, %arg1: i32, %arg2: i32, %arg3: i32) -> (i32, i32, i32) {
    %c0_i32 = arith.constant 0 : i32
    %c0_i32_0 = arith.constant 0 : i32
    return %arg0, %c0_i32, %arg2 : i32, i32, i32
  }
  func.func @transform_3(%arg0: i32, %arg1: i32, %arg2: i32, %arg3: i32) -> (i32, i32) {
    %c1_i32 = arith.constant 1 : i32
    %0 = arith.muli %arg0, %c1_i32 : i32
    %1 = arith.addi %0, %arg2 : i32
    %c0_i32 = arith.constant 0 : i32
    return %arg1, %1 : i32, i32
  }
}

</mosaic_0001>

<bundles_post_ra>
// kernel: tpu_custom_call.1
= control target key start
LH: loop header
LB: loop body
LE: loop exit
PB: predicated region body
PF: predicated region fallthrough
CT: control target
= control target key end

     0   :  { %s1107_s0 = inlined_call_operand.hbm [shape: bf16[2,512], index: 0, kind: input, shape index: {}]   ;;  %s1108_s1 = inlined_call_operand.hbm [shape: bf16[4,128,128], index: 1, kind: input, shape index: {}]   ;;  %s1109_s2 = inlined_call_operand.hbm [shape: f32[4,1,128], index: 2, kind: input, shape index: {}]   ;;  %s1110_s3 = inlined_call_operand.hbm [shape: f32[2,512], index: 3, kind: output, shape index: {}]  }
   0x1   :  { %1111 = sst [smem:[#allocation12_spill]] %s1107_s0 }
   0x2   :  { %1112 = sst [smem:[#allocation13_spill]] %s1108_s1 }
   0x3   :  { %8 = vsyncpa [#allocation3], 0 }
   0x4   :  { %10 = vsyncpa [#allocation3 + $0x1], 0 }
   0x5   :  { %11 = vsyncpa [#allocation6], 0 }
   0x6   :  { %13 = vsyncpa [#allocation6 + $0x1], 0 }
   0x7   :  { %14 = vsyncpa [#allocation4], 0 }
   0x8   :  { %16 = vsyncpa [#allocation4 + $0x1], 0  ;;  %s916_s12 = smov 0   ;;  %s918_s13 = smov 0  }
   0x9   :  { %s920_s14 = smov 0   ;;  %s922_s15 = smov 0  }
   0xa   :  { %s924_s16 = smov 0   ;;  %s926_s17 = smov 0  }
   0xb LB: > { %s947_s18 = sadd.s32 4294967295, %s886_s17   ;;  %s580_s19 = sadd.s32 4294967294, %s886_s17   ;;  %s886_s17 = sphi %s926_s17, %s22_s17   ;;  %s882_s16 = sphi %s924_s16, %s1125_s16   ;;  %s878_s15 = sphi %s922_s15, %s1124_s15   ;;  %s874_s14 = sphi %s920_s14, %s1123_s14   ;;  %s870_s13 = sphi %s918_s13, %s1122_s13   ;;  %s866_s12 = sphi %s916_s12, %s1121_s12  }
   0xc   : > { %s48_s20 = sadd.s32 1, %s882_s16  ;;  %s59_s21 = sadd.s32 1, %s874_s14 }
   0xd   : > { %p50_p0 = scmp.ge.s32.totalorder %s48_s20, 4  ;;  %p66_p1 = scmp.ne.s32.totalorder %s874_s14, %s870_s13 }
   0xe   : > { %p67_p2 = scmp.eq.s32.totalorder %s886_s17, 0  ;;  %p72_p3 = scmp.ne.s32.totalorder %s870_s13, %s866_s12 }
   0xf   : > { %s1127_s20 = smov (%p50_p0, %s48_s20), 0  ;;  %p73_p5 = scmp.eq.s32.totalorder %s947_s18, 0 }
  0x10   : > { %p959_p4 = por %p67_p2, %p66_p1  ;;  %s55_s23 = ssub.s32 %s882_s16, %s1127_s20 }
  0x11   : > { %p158_p6 = scmp.eq.s32.totalorder %s947_s18, 3  ;;  %p57_p7 = scmp.eq.s32.totalorder %s55_s23, 0 }
  0x12   : > { %p967_p8 = por %p73_p5, %p72_p3  ;;  %p164_p10 = scmp.eq.s32.totalorder %s580_s19, 3 }
  0x13   : > { %p971_p9 = por %p158_p6, %p66_p1  ;;  %p656_p12 = scmp.lt.s32.totalorder %s886_s17, 4 }
  0x14   : > { %s976_s26 = scalar_select %p57_p7, %s874_s14, %s59_s21  }
  0x15   : > { %p978_p11 = por %p164_p10, %p72_p3  ;;  %s984_s28 = sand.u32 1, %s874_s14  }
  0x16   : > { %s204_s29 = sand.u32 1, %s886_s17   ;;  %s584_s30 = sshll.u32 %s984_s28, 6 }
  0x17   : > { %p990_p13 = pnand %p656_p12, %p959_p4  ;;  %s604_s5 = sshll.u32 %s882_s16, 10 }
  0x18   : > { %s1118_s1 = sld [smem:[#allocation13_spill]]  ;;  %s208_s9 = scalar_lea.vmem [#allocation5], %s584_s30 }
  0x19   : > { %s218_s10 = sshll.u32 %s208_s9, 4  ;;  %s998_s11 = scalar_lea.sflag [#allocation6], %s204_s29  ;;  %s219_s10 = int_to_ptr.vmem [resolvable:$true] %s218_s10 }
  0x1a   : > { %p720_p0 = pneg %p990_p13  ;;  %s731_s19 = scalar_lea.vmem %s219_s10, 1024 }
  0x1b   : > { %p732_p1 = scmp.ne.s32.totalorder %s219_s10, %s731_s19  ;;  %s888_s21 = smov [#allocation5]  }
  0x1c   : > { %s736_s22 = sshll.u32 %s888_s21, 4  ;;  %s737_s22 = int_to_ptr.vmem [resolvable:$false] %s736_s22 }
  0x1d   : > { %p734_p2 = pnand %p732_p1, %p720_p0  ;;  %s738_s23 = scalar_lea.vmem %s737_s22, 2048 }
  0x1e   : > { %s217_s8 = scalar_lea.hbm %s1118_s1, %s604_s5  ;;  %p739_p4 = scmp.lt.s32.totalorder %s219_s10, %s737_s22 }
  0x1f   : > { %p735_p3 = pneg %p734_p2  ;;  %p740_p5 = scmp.lt.s32.totalorder %s738_s23, %s731_s19 }
  0x21   : > { %p741_p6 = por %p740_p5, %p739_p4 }
  0x23   : > { %p742_p7 = pnand %p741_p6, %p735_p3 }
  0x25   : > { %745 = shalt.err (!%p742_p7)
}
  0x26   : > { %s889_s30 = smov 64   ;;  %s890_s29 = smov 4  }
  0x27   : > { %648 = dma.hbm_to_vmem [thread:$0]  (!%p990_p13), %s217_s8, 1024, %s219_s10, %s998_s11, %s889_s30, %s889_s30, %s890_s29  }
  0x28   : > { %p588_p10 = scmp.ge.s32.totalorder %s886_s17, 1  ;;  %p244_p12 = scmp.lt.s32.totalorder %s886_s17, 5 }
  0x29   : > { %s583_s6 = sshll.u32 %s882_s16, 4  ;;  %s1120_s0 = sld [smem:[#allocation12_spill]] }
  0x2a   : > { %p1010_p1 = pnand %p588_p10, %p244_p12  ;;  %s187_s21 = scalar_lea.vmem [#allocation2], %s984_s28 }
  0x2b   : > { %s197_s22 = sshll.u32 %s187_s21, 4  ;;  %s185_s23 = scalar_lea.sflag [#allocation3], %s984_s28  ;;  %s198_s22 = int_to_ptr.vmem [resolvable:$true] %s197_s22 }
  0x2c   : > { %s759_s1 = scalar_lea.vmem %s198_s22, 16  ;;  %s891_s8 = smov [#allocation2]  }
  0x2d   : > { %p760_p2 = scmp.ne.s32.totalorder %s198_s22, %s759_s1  ;;  %s764_s10 = sshll.u32 %s891_s8, 4  ;;  %s765_s10 = int_to_ptr.vmem [resolvable:$false] %s764_s10 }
  0x2e   : > { %s766_s30 = scalar_lea.vmem %s765_s10, 32  ;;  %p767_p5 = scmp.lt.s32.totalorder %s198_s22, %s765_s10 }
  0x2f   : > { %s195_s19 = scalar_lea.hbm %s1120_s0, %s583_s6  ;;  %p762_p3 = pnand %p760_p2, %p720_p0 }
  0x30   : > { %p768_p6 = scmp.lt.s32.totalorder %s766_s30, %s759_s1 }
  0x31   : > { %p763_p4 = pneg %p762_p3 }
  0x32   : > { %p769_p7 = por %p768_p6, %p767_p5 }
  0x34   : > { %p770_p10 = pnand %p769_p7, %p763_p4 }
  0x36   : > { %773 = shalt.err (!%p770_p10)
}
  0x37   : > { %645 = dma.hbm_to_vmem [thread:$0]  (!%p990_p13), %s195_s19, 16, %s198_s22, %s185_s23  }
  0x38   : > { %s237_s9 = scalar_lea.hbm %s1109_s2, %s583_s6  ;;  %s231_s21 = scalar_lea.vmem [#allocation7], %s984_s28 }
  0x39   : > { %s239_s0 = sshll.u32 %s231_s21, 4  ;;  %s892_s1 = smov [#allocation7]   ;;  %s240_s0 = int_to_ptr.vmem [resolvable:$true] %s239_s0 }
  0x3a   : > { %s787_s8 = scalar_lea.vmem %s240_s0, 16  ;;  %s792_s10 = sshll.u32 %s892_s1, 4  ;;  %s793_s10 = int_to_ptr.vmem [resolvable:$false] %s792_s10 }
  0x3b   : > { %p788_p12 = scmp.ne.s32.totalorder %s240_s0, %s787_s8  ;;  %s794_s30 = scalar_lea.vmem %s793_s10, 32 }
  0x3c   : > { %p795_p4 = scmp.lt.s32.totalorder %s240_s0, %s793_s10  ;;  %p796_p5 = scmp.lt.s32.totalorder %s794_s30, %s787_s8 }
  0x3d   : > { %p790_p2 = pnand %p788_p12, %p720_p0 }
  0x3e   : > { %p797_p6 = por %p796_p5, %p795_p4 }
  0x3f   : > { %p791_p3 = pneg %p790_p2 }
  0x41   : > { %p798_p7 = pnand %p797_p6, %p791_p3 }
  0x43   : > { %801 = shalt.err (!%p798_p7)
}
  0x44   : > { %651 = dma.hbm_to_vmem [thread:$0]  (!%p990_p13), %s237_s9, 16, %s240_s0, %s998_s11  }
  0x45   : > { %248 = sbr.rel (%p1010_p1) target bundleno = 320 (0x140), region = 32  ;;  %s1038_s28 = sand.u32 (!%p1010_p1), 1, %s870_s13  }
  0x46   : > { %s251_s6 = scalar_lea.sflag (!%p1010_p1), [#allocation3], %s1038_s28  ;;  %s253_s19 = scalar_lea.vmem (!%p1010_p1), [#allocation2], %s1038_s28 }
  0x4a   : > { %853 = dma.done.wait (%p967_p8), %s251_s6, 16  }
  0x4b   : > { %855 = vsyncadd (%p967_p8), %s251_s6, 4294967280  ;;  %s258_s0 = sand.u32 1, %s947_s18   ;;  %s589_s4 = sshll.u32 %s1038_s28, 6 }
  0x4c   : > { %s259_s11 = scalar_lea.sflag [#allocation6], %s258_s0  ;;  %s262_s5 = scalar_lea.vmem [#allocation5], %s589_s4 }
  0x4d   : > { %857 = dma.done.wait (%p967_p8), %s259_s11, 1040  }
  0x4e   : > { %859 = vsyncadd (%p967_p8), %s259_s11, 4294966256  ;;  %v893_v0 = vmov 0.0   ;;  %vm894_vm0 = vmmov 0   ;;  %v710_v1 = vld [vmem:[%s262_s5 + $0x38] sm:$0xff]   ;;  %v711_v2 = vld [vmem:[%s262_s5 + $0x30] sm:$0xff]   ;;  %s590_s18 = sshll.u32 %s1038_s28, 1 }
  0x4f   : > { %614 = vmatprep.subr.bf16.mxu0 %v893_v0  ;;  %630 = vmatprep.mubr.msk.bf16.mxu0 %vm894_vm0, %v893_v0  ;;  %v712_v3 = vld [vmem:[%s262_s5 + $0x28] sm:$0xff]   ;;  %v713_v4 = vld [vmem:[%s262_s5 + $0x20] sm:$0xff]   ;;  %v714_v5 = vld [vmem:[%s262_s5 + $0x18] sm:$0xff]   ;;  %s270_s24 = scalar_lea.vmem [#allocation7], %s1038_s28  ;;  %s601_s22 = sshll.u32 %s878_s15, 5 }
  0x50   : > { %615 = vmatpush3.bf16.msra.mxu0 %v710_v1  ;;  %v715_v6 = vld [vmem:[%s262_s5 + $0x10] sm:$0xff]   ;;  %v716_v7 = vld [vmem:[%s262_s5 + $0x8] sm:$0xff]   ;;  %v717_v8 = vld [vmem:[%s262_s5] sm:$0xff]   ;;  %s300_s23 = scalar_lea.vmem [#allocation8], %s590_s18  ;;  %s1060_s21 = scalar_lea.hbm %s1110_s3, %s601_s22 }
  0x51   : > { %616 = vmatprep.subr.bf16.mxu0 %v893_v0  ;;  %v305_v9 = vld [vmem:[%s253_s19] sm:$0x1]  ;;  %s447_s29 = sshll.u32 %s300_s23, 4  ;;  %s431_s8 = scalar_lea.sflag [#allocation4], %s1038_s28  ;;  %s1062_s29 = int_to_ptr.vmem [resolvable:$true] %s447_s29 }
  0x52   : > { %v599_v10 = vld [vmem:[%s270_s24] ss:$0 sm:$0xff]  ;;  %s802_s1 = scalar_lea.vmem %s1062_s29, 32  ;;  %s895_s15 = smov [#allocation8]  }
  0x53   : > { %p803_p8 = scmp.ne.s32.totalorder %s1062_s29, %s802_s1  ;;  %s806_s10 = sshll.u32 %s895_s15, 4  ;;  %s807_s10 = int_to_ptr.vmem [resolvable:$false] %s806_s10 }
  0x54   : > { %617 = vmatpush3.bf16.msra.mxu0 %v711_v2  ;;  %s808_s30 = scalar_lea.vmem %s807_s10, 64  ;;  %p809_p1 = scmp.lt.s32.totalorder %s1062_s29, %s807_s10 }
  0x55   : > { %618 = vmatprep.subr.bf16.mxu0 %v893_v0  ;;  %p804_p13 = pnand %p803_p8, %p971_p9  ;;  %p810_p10 = scmp.lt.s32.totalorder %s808_s30, %s802_s1 }
  0x57   : > { %p805_p0 = pneg %p804_p13  ;;  %p811_p12 = por %p810_p10, %p809_p1 }
  0x58   : > { %619 = vmatpush3.bf16.msra.mxu0 %v712_v3 }
  0x59   : > { %620 = vmatprep.subr.bf16.mxu0 %v893_v0  ;;  %p812_p2 = pnand %p811_p12, %p805_p0 }
  0x5c   : > { %621 = vmatpush3.bf16.msra.mxu0 %v713_v4 }
  0x5d   : > { %622 = vmatprep.subr.bf16.mxu0 %v893_v0 }
  0x60   : > { %623 = vmatpush3.bf16.msra.mxu0 %v714_v5 }
  0x61   : > { %624 = vmatprep.subr.bf16.mxu0 %v893_v0 }
  0x64   : > { %625 = vmatpush3.bf16.msra.mxu0 %v715_v6 }
  0x65   : > { %626 = vmatprep.subr.bf16.mxu0 %v893_v0 }
  0x68   : > { %627 = vmatpush3.bf16.msra.mxu0 %v716_v7 }
  0x69   : > { %628 = vmatprep.subr.bf16.mxu0 %v893_v0 }
  0x6c   : > { %629 = vmatpush3.bf16.msra.mxu0 %v717_v8 }
  0x6f   : > { %631 = vmatmul.mubr.bf16.vlgmr.msra.gmra.mxu0 %v305_v9 }
 0x12f   : > { %v404_v11 = vpop.f32.mrf.mxu0 }
 0x130   : > { %v421_v12 = vadd.f32 %v599_v10, %v404_v11 }
 0x131   : > { %v632_v13 = vpop.f32.mrf.mxu0 }
 0x132   : > { %422 = vst [vmem:[%s300_s23] sm:$0x3] %v421_v12 }
 0x133   : > { %v407_v14 = vpop.f32.mrf.mxu0 }
 0x134   : > { %815 = shalt.err (!%p812_p2)
}
 0x135   : > { %s816_s6 = scalar_lea.hbm %s1060_s21, 32  ;;  %s820_s0 = scalar_lea.hbm %s1110_s3, 128 }
 0x136   : > { %p817_p3 = scmp.ne.s32.totalorder %s1060_s21, %s816_s6  ;;  %p821_p6 = scmp.lt.s32.totalorder %s1060_s21, %s1110_s3 }
 0x137   : > { %p822_p7 = scmp.lt.s32.totalorder %s820_s0, %s816_s6 }
 0x138   : > { %p818_p4 = pnand %p817_p3, %p971_p9 }
 0x139   : > { %p823_p8 = por %p822_p7, %p821_p6 }
 0x13a   : > { %p819_p5 = pneg %p818_p4 }
 0x13c   : > { %p824_p13 = pnand %p823_p8, %p819_p5 }
 0x13e   : > { %827 = shalt.err (!%p824_p13)
}
 0x13f   : > { %640 = dma.vmem_to_hbm [thread:$0]  (%p971_p9), %s1062_s29, 32, %s1060_s21, %s431_s8   ;;  %v633_v15 = vpop.f32.mrf.mxu0 }
 0x140 PF: > { %p657_p0 = scmp.ge.s32.totalorder %s886_s17, 2  ;;  %s459_s5 = sand.u32 1, %s866_s12  }
 0x141   : > { %s460_s18 = scalar_lea.sflag [#allocation4], %s459_s5 }
 0x142   : > { %p653_p1 = pnand %p657_p0, %p978_p11 }
 0x144   : > { %p654_p10 = pneg %p653_p1 }
 0x146   : > { %861 = dma.done.wait (%p654_p10), %s460_s18, 32  }
 0x147   : > { %863 = vsyncadd (%p654_p10), %s460_s18, 4294967264  ;;  %s22_s17 = sadd.s32 1, %s886_s17   ;;  %s1121_s12 = smov %s870_s13 }
 0x148   : > { %p19_p12 = scmp.ge.s32.totalorder %s22_s17, 6   ;;  %s1122_s13 = smov %s874_s14 }
 0x149   : > { %s1123_s14 = smov %s976_s26  ;;  %s1124_s15 = smov %s882_s16 }
 0x14a   : > { %s1125_s16 = smov %s1127_s20  ;;  %21 = sbr.rel (!%p19_p12) target bundleno = 11 (0xb), region = 109 }
 0x14f   :  { %465 = vsyncpa [#allocation3], 1 }
 0x150   :  { %467 = vsyncpa [#allocation3 + $0x1], 1 }
 0x151   :  { %468 = vsyncpa [#allocation6], 1 }
 0x152   :  { %470 = vsyncpa [#allocation6 + $0x1], 1 }
 0x153   :  { %471 = vsyncpa [#allocation4], 1 }
 0x154   :  { %473 = vsyncpa [#allocation4 + $0x1], 1 }

</bundles_post_ra>
